<compile_context>
chip_gen: v6e
topology: v6e:2x2x1
jax: 0.10.0
libtpu: 0.0.40
codegen_flags: <defaults>
</compile_context>

<pallas_src>
import functools

import jax
import jax.numpy as jnp
from jax.experimental import pallas as pl
from jax.experimental.pallas import tpu as pltpu
import numpy as np

LANE = 128      # lane width  (last-dim alignment)
SUBLANE = 8     # sublane width (second-to-last-dim alignment)


def _round_up(n, m):
    return ((n + m - 1) // m) * m


# -----------------------------------------------------------------------------
# Kernel
# -----------------------------------------------------------------------------
def _decoder_kernel(n_layers, feat_pad, out_pad, x_ref, w_ref, b_ref, out_ref):
    """Fused MLP forward for one batch tile.

    x_ref  : (tile_b, feat_pad) f32                         -- zero-padded input tile
    w_ref  : (feat_pad, (n_layers-1)*feat_pad + out_pad) f32 -- packed weights (in, out)
    b_ref  : (1,        (n_layers-1)*feat_pad + out_pad) f32 -- packed biases
    out_ref: (tile_b, out_pad) f32

    Layer i occupies columns [i*feat_pad, i*feat_pad + width_i) of the slabs,
    width_i = feat_pad for all but the last layer (= out_pad).  All offsets are
    128-aligned so the static slices never cross vreg tiles.
    """
    h = x_ref[...]                                    # already f32, no cast
    for i in range(n_layers):
        width = feat_pad if i < n_layers - 1 else out_pad
        off = i * feat_pad
        w = w_ref[:, off:off + width]                 # (feat_pad, width)
        b = b_ref[:, off:off + width]                 # (1, width)
        h = jnp.dot(h, w, preferred_element_type=jnp.float32) + b
        if i < n_layers - 1:                          # activation on all but last
            h = jnp.maximum(h, 0.0)                   # F.relu
    out_ref[...] = h


# -----------------------------------------------------------------------------
# Parameter construction / packing (mirrors Decoder.__init__)
# -----------------------------------------------------------------------------
def init_decoder_params(key, latent_dim, hidden_size, inp_dim, no_layers=3):
    """xavier_normal_ weights, zero biases.  Returns [(W_t, b)] with W_t (in, out)."""
    out_dim = int(np.prod(inp_dim))
    dims = [latent_dim] + [hidden_size] * (no_layers + 1) + [out_dim]
    params = []
    for i in range(len(dims) - 1):
        fan_in, fan_out = dims[i], dims[i + 1]
        key, sub = jax.random.split(key)
        std = float(np.sqrt(2.0 / (fan_in + fan_out)))  # xavier_normal_
        # PyTorch weight is (out, in); store transposed as (in, out) for h @ W.
        w_t = std * jax.random.normal(sub, (fan_in, fan_out), dtype=jnp.float32)
        b = jnp.zeros((1, fan_out), dtype=jnp.float32)
        params.append((w_t, b))
    return params


def pack_decoder_params(params):
    """Zero-pad each layer to lane-dense shapes and concatenate along the output
    axis into one weight slab + one bias row.  Done once, off the hot path."""
    n_layers = len(params)
    in_dims = [w.shape[0] for w, _ in params]
    mid_out_dims = [w.shape[1] for w, _ in params[:-1]]
    out_dim = params[-1][0].shape[1]

    feat_pad = _round_up(max(in_dims + mid_out_dims), LANE)
    out_pad = _round_up(out_dim, LANE)

    w_blocks, b_blocks = [], []
    for i, (w, b) in enumerate(params):
        opad = feat_pad if i < n_layers - 1 else out_pad
        wp = jnp.zeros((feat_pad, opad), jnp.float32)
        wp = wp.at[: w.shape[0], : w.shape[1]].set(w)
        bp = jnp.zeros((1, opad), jnp.float32)
        bp = bp.at[:, : b.shape[1]].set(b.reshape(1, -1))
        w_blocks.append(wp)
        b_blocks.append(bp)

    w_slab = jnp.concatenate(w_blocks, axis=1)   # (feat_pad, (n-1)*feat_pad + out_pad)
    b_slab = jnp.concatenate(b_blocks, axis=1)   # (1,        (n-1)*feat_pad + out_pad)
    meta = dict(n_layers=n_layers, feat_pad=feat_pad, out_pad=out_pad, out_dim=out_dim)
    return w_slab, b_slab, meta


# -----------------------------------------------------------------------------
# Forward wrapper
# -----------------------------------------------------------------------------
@functools.partial(jax.jit, static_argnames=("n_layers", "feat_pad", "out_pad", "out_dim"))
def decoder_forward(x, w_slab, b_slab, *, n_layers, feat_pad, out_pad, out_dim):
    """x: (B, latent_dim) float32 -> (B, out_dim) float32."""
    B, latent = x.shape

    # Batch tile: one sublane-aligned tile for small B; 256-row tiles for big B.
    tile_b = 256 if B > 256 else max(_round_up(B, SUBLANE), SUBLANE)
    b_pad = _round_up(max(B, tile_b), tile_b)
    n_tiles = b_pad // tile_b

    # Sublane/lane-dense padded input (zeros elsewhere).
    x_pad = jnp.zeros((b_pad, feat_pad), jnp.float32).at[:B, :latent].set(x)

    slab_cols = w_slab.shape[1]
    flops = 2 * b_pad * ((n_layers - 1) * feat_pad * feat_pad + feat_pad * out_pad)
    bytes_accessed = 4 * (x_pad.size + n_tiles * (w_slab.size + b_slab.size)
                          + b_pad * out_pad)

    kernel = functools.partial(_decoder_kernel, n_layers, feat_pad, out_pad)
    out_padded = pl.pallas_call(
        kernel,
        out_shape=jax.ShapeDtypeStruct((b_pad, out_pad), jnp.float32),
        grid=(n_tiles,),
        in_specs=[
            pl.BlockSpec((tile_b, feat_pad), lambda i: (i, 0)),      # x tile
            pl.BlockSpec((feat_pad, slab_cols), lambda i: (0, 0)),   # weights (resident)
            pl.BlockSpec((1, slab_cols), lambda i: (0, 0)),          # biases  (resident)
        ],
        out_specs=pl.BlockSpec((tile_b, out_pad), lambda i: (i, 0)),
        compiler_params=pltpu.CompilerParams(
            dimension_semantics=("parallel",)),
        cost_estimate=pl.CostEstimate(
            flops=flops, transcendentals=0, bytes_accessed=bytes_accessed),
    )(x_pad, w_slab, b_slab)

    return out_padded[:B, :out_dim]


# -----------------------------------------------------------------------------
# Pure-JAX reference (mirrors Decoder.forward)
# -----------------------------------------------------------------------------
def decoder_reference(x, params):
    h = x.reshape(x.shape[0], -1)
    for i, (w, b) in enumerate(params):
        h = h @ w + b
        if i < len(params) - 1:
            h = jnp.maximum(h, 0.0)
    return h


if __name__ == "__main__":
    # Small shapes consistent with the module: latent=8, hidden=32,
    # image inp_dim=(1, 16, 16) -> 256 outputs, no_layers=3, batch=2.
    latent_dim, hidden_size, inp_dim, no_layers = 8, 32, (1, 16, 16), 3
    batch = 2

    key = jax.random.PRNGKey(0)
    key, xkey = jax.random.split(key)
    x = jax.random.normal(xkey, (batch, latent_dim), dtype=jnp.float32)

    params = init_decoder_params(key, latent_dim, hidden_size, inp_dim, no_layers)
    w_slab, b_slab, meta = pack_decoder_params(params)

    out = decoder_forward(x, w_slab, b_slab, **meta)
    out = jax.block_until_ready(out)

    ref = decoder_reference(x, params)
    np.testing.assert_allclose(np.asarray(out), np.asarray(ref), rtol=1e-5, atol=1e-5)

    assert out.shape == (batch, int(np.prod(inp_dim)))
    print("KERNEL_OK")
</pallas_src>

<mosaic_0001>
module attributes {stable_mosaic.version = 11 : i64} {
  func.func @_decoder_kernel(%arg0: i32, %arg1: memref<8x128xf32, #tpu.memory_space<vmem>>, %arg2: memref<128x768xf32, #tpu.memory_space<vmem>>, %arg3: memref<1x768xf32, #tpu.memory_space<vmem>>, %arg4: memref<8x256xf32, #tpu.memory_space<vmem>>) attributes {dimension_semantics = [#tpu.dimension_semantics<parallel>], iteration_bounds = array<i64: 1>, scalar_prefetch = 0 : i64, scratch_operands = 0 : i64, tpu.core_type = #tpu.core_type<tc>, window_params = [{transform_indices = @transform_0, window_bounds = array<i64: 8, 128>}, {pipeline_mode = #tpu.pipeline_mode<synchronous>, transform_indices = @transform_1, window_bounds = array<i64: 128, 768>}, {pipeline_mode = #tpu.pipeline_mode<synchronous>, transform_indices = @transform_2, window_bounds = array<i64: 1, 768>}, {transform_indices = @transform_3, window_bounds = array<i64: 8, 256>}]} {
    %c0 = arith.constant 0 : index
    %c0_0 = arith.constant 0 : index
    %0 = vector.load %arg1[%c0, %c0_0] : memref<8x128xf32, #tpu.memory_space<vmem>>, vector<8x128xf32>
    %c0_1 = arith.constant 0 : index
    %c0_2 = arith.constant 0 : index
    %1 = vector.load %arg2[%c0_1, %c0_2] : memref<128x768xf32, #tpu.memory_space<vmem>>, vector<128x128xf32>
    %c0_3 = arith.constant 0 : index
    %c0_4 = arith.constant 0 : index
    %2 = vector.load %arg3[%c0_3, %c0_4] : memref<1x768xf32, #tpu.memory_space<vmem>>, vector<1x128xf32>
    %cst = arith.constant dense<0.000000e+00> : vector<8x128xf32>
    %3 = tpu.matmul %0, %1, %cst {dimension_numbers = #tpu.dot_dimension_numbers<[1], [0], [0], [1], [0, 0, 1, 1], [], []>} : vector<8x128xf32>, vector<128x128xf32>, vector<8x128xf32> -> vector<8x128xf32>
    %4 = vector.broadcast %2 : vector<1x128xf32> to vector<8x128xf32>
    %5 = arith.addf %3, %4 : vector<8x128xf32>
    %cst_5 = arith.constant 0.000000e+00 : f32
    %6 = vector.broadcast %cst_5 : f32 to vector<8x128xf32>
    %7 = arith.maximumf %5, %6 : vector<8x128xf32>
    %c0_6 = arith.constant 0 : index
    %c128 = arith.constant 128 : index
    %8 = vector.load %arg2[%c0_6, %c128] : memref<128x768xf32, #tpu.memory_space<vmem>>, vector<128x128xf32>
    %c0_7 = arith.constant 0 : index
    %c128_8 = arith.constant 128 : index
    %9 = vector.load %arg3[%c0_7, %c128_8] : memref<1x768xf32, #tpu.memory_space<vmem>>, vector<1x128xf32>
    %cst_9 = arith.constant dense<0.000000e+00> : vector<8x128xf32>
    %10 = tpu.matmul %7, %8, %cst_9 {dimension_numbers = #tpu.dot_dimension_numbers<[1], [0], [0], [1], [0, 0, 1, 1], [], []>} : vector<8x128xf32>, vector<128x128xf32>, vector<8x128xf32> -> vector<8x128xf32>
    %11 = vector.broadcast %9 : vector<1x128xf32> to vector<8x128xf32>
    %12 = arith.addf %10, %11 : vector<8x128xf32>
    %cst_10 = arith.constant 0.000000e+00 : f32
    %13 = vector.broadcast %cst_10 : f32 to vector<8x128xf32>
    %14 = arith.maximumf %12, %13 : vector<8x128xf32>
    %c0_11 = arith.constant 0 : index
    %c256 = arith.constant 256 : index
    %15 = vector.load %arg2[%c0_11, %c256] : memref<128x768xf32, #tpu.memory_space<vmem>>, vector<128x128xf32>
    %c0_12 = arith.constant 0 : index
    %c256_13 = arith.constant 256 : index
    %16 = vector.load %arg3[%c0_12, %c256_13] : memref<1x768xf32, #tpu.memory_space<vmem>>, vector<1x128xf32>
    %cst_14 = arith.constant dense<0.000000e+00> : vector<8x128xf32>
    %17 = tpu.matmul %14, %15, %cst_14 {dimension_numbers = #tpu.dot_dimension_numbers<[1], [0], [0], [1], [0, 0, 1, 1], [], []>} : vector<8x128xf32>, vector<128x128xf32>, vector<8x128xf32> -> vector<8x128xf32>
    %18 = vector.broadcast %16 : vector<1x128xf32> to vector<8x128xf32>
    %19 = arith.addf %17, %18 : vector<8x128xf32>
    %cst_15 = arith.constant 0.000000e+00 : f32
    %20 = vector.broadcast %cst_15 : f32 to vector<8x128xf32>
    %21 = arith.maximumf %19, %20 : vector<8x128xf32>
    %c0_16 = arith.constant 0 : index
    %c384 = arith.constant 384 : index
    %22 = vector.load %arg2[%c0_16, %c384] : memref<128x768xf32, #tpu.memory_space<vmem>>, vector<128x128xf32>
    %c0_17 = arith.constant 0 : index
    %c384_18 = arith.constant 384 : index
    %23 = vector.load %arg3[%c0_17, %c384_18] : memref<1x768xf32, #tpu.memory_space<vmem>>, vector<1x128xf32>
    %cst_19 = arith.constant dense<0.000000e+00> : vector<8x128xf32>
    %24 = tpu.matmul %21, %22, %cst_19 {dimension_numbers = #tpu.dot_dimension_numbers<[1], [0], [0], [1], [0, 0, 1, 1], [], []>} : vector<8x128xf32>, vector<128x128xf32>, vector<8x128xf32> -> vector<8x128xf32>
    %25 = vector.broadcast %23 : vector<1x128xf32> to vector<8x128xf32>
    %26 = arith.addf %24, %25 : vector<8x128xf32>
    %cst_20 = arith.constant 0.000000e+00 : f32
    %27 = vector.broadcast %cst_20 : f32 to vector<8x128xf32>
    %28 = arith.maximumf %26, %27 : vector<8x128xf32>
    %c0_21 = arith.constant 0 : index
    %c512 = arith.constant 512 : index
    %29 = vector.load %arg2[%c0_21, %c512] : memref<128x768xf32, #tpu.memory_space<vmem>>, vector<128x256xf32>
    %c0_22 = arith.constant 0 : index
    %c512_23 = arith.constant 512 : index
    %30 = vector.load %arg3[%c0_22, %c512_23] : memref<1x768xf32, #tpu.memory_space<vmem>>, vector<1x256xf32>
    %cst_24 = arith.constant dense<0.000000e+00> : vector<8x256xf32>
    %31 = tpu.matmul %28, %29, %cst_24 {dimension_numbers = #tpu.dot_dimension_numbers<[1], [0], [0], [1], [0, 0, 1, 1], [], []>} : vector<8x128xf32>, vector<128x256xf32>, vector<8x256xf32> -> vector<8x256xf32>
    %32 = vector.broadcast %30 : vector<1x256xf32> to vector<8x256xf32>
    %33 = arith.addf %31, %32 : vector<8x256xf32>
    %c0_25 = arith.constant 0 : index
    %c0_26 = arith.constant 0 : index
    %34 = vector.load %arg4[%c0_25, %c0_26] : memref<8x256xf32, #tpu.memory_space<vmem>>, vector<8x256xf32>
    tpu.vector_store %arg4[%c0_25, %c0_26], %33 {strides = array<i32>} : memref<8x256xf32, #tpu.memory_space<vmem>>, vector<8x256xf32>,
    return
  }
  func.func @transform_0(%arg0: i32) -> (i32, i32) {
    %c0_i32 = arith.constant 0 : i32
    %c0_i32_0 = arith.constant 0 : i32
    return %arg0, %c0_i32 : i32, i32
  }
  func.func @transform_1(%arg0: i32) -> (i32, i32) {
    %c0_i32 = arith.constant 0 : i32
    %c0_i32_0 = arith.constant 0 : i32
    %c0_i32_1 = arith.constant 0 : i32
    return %c0_i32, %c0_i32_0 : i32, i32
  }
  func.func @transform_2(%arg0: i32) -> (i32, i32) {
    %c0_i32 = arith.constant 0 : i32
    %c0_i32_0 = arith.constant 0 : i32
    %c0_i32_1 = arith.constant 0 : i32
    return %c0_i32, %c0_i32_0 : i32, i32
  }
  func.func @transform_3(%arg0: i32) -> (i32, i32) {
    %c0_i32 = arith.constant 0 : i32
    %c0_i32_0 = arith.constant 0 : i32
    return %arg0, %c0_i32 : i32, i32
  }
}

</mosaic_0001>

<bundles_post_ra>
// kernel: decoder_forward.1
= control target key start
LH: loop header
LB: loop body
LE: loop exit
PB: predicated region body
PF: predicated region fallthrough
CT: control target
= control target key end

     0   :  { %8 = vsyncpa [#allocation3], 0  ;;  %s766_s12 = smov [#allocation2]   ;;  %s891_s0 = inlined_call_operand.vmem [shape: f32[8,128], index: 0, kind: input, shape index: {}]   ;;  %s892_s1 = inlined_call_operand.hbm [shape: f32[128,768], index: 1, kind: input, shape index: {}]   ;;  %s893_s2 = inlined_call_operand.vmem [shape: f32[1,768], index: 2, kind: input, shape index: {}]   ;;  %s894_s3 = inlined_call_operand.vmem [shape: f32[8,256], index: 3, kind: output, shape index: {}]  }
   0x1   :  { %s16_s13 = sshll.u32 %s766_s12, 4  ;;  %s17_s13 = int_to_ptr.vmem [resolvable:$true] %s16_s13 }
   0x2   :  { %s752_s14 = scalar_lea.vmem %s17_s13, 12288  ;;  %p757_p1 = scmp.lt.s32.totalorder %s17_s13, %s17_s13 }
   0x3   :  { %p753_p0 = scmp.ne.s32.totalorder %s17_s13, %s752_s14  ;;  %p758_p2 = scmp.lt.s32.totalorder %s752_s14, %s752_s14 }
   0x5   :  { %p759_p3 = por %p758_p2, %p757_p1 }
   0x7   :  { %p760_p4 = pnand %p759_p3, %p753_p0 }
   0x9   :  { %763 = shalt.err (!%p760_p4)
}
   0xa   :  { %s767_s15 = smov 768   ;;  %s768_s16 = smov 48  }
   0xb   :  { %22 = dma.hbm_to_vmem [thread:$0]  %s892_s1, 12288, %s17_s13, [#allocation3], %s767_s15, %s767_s15, %s768_s16  }
   0xc   :  { %764 = dma.done.wait [#allocation3], 12288  }
   0xd   :  { %765 = vsyncadd [#allocation3], 4294955008  ;;  %v769_v0 = vmov 0.0   ;;  %vm770_vm0 = vmmov 0   ;;  %v44_v1 = vld [vmem:[#allocation2 + $0x2d0] sm:$0xff]  ;;  %v43_v2 = vld [vmem:[#allocation2 + $0x2a0] sm:$0xff] }
   0xe   :  { %599 = vmatprep.subr.mxu0 %v769_v0  ;;  %631 = vmatprep.mubr.msk.f32.mxu0 %vm770_vm0, %v769_v0  ;;  %v42_v3 = vld [vmem:[#allocation2 + $0x270] sm:$0xff]  ;;  %v41_v4 = vld [vmem:[#allocation2 + $0x240] sm:$0xff]  ;;  %v138_v5 = vld [vmem:[#allocation2 + $0x2d8] sm:$0xff] }
   0xf   :  { %634 = vmatprep.subr.mxu1 %v769_v0  ;;  %666 = vmatprep.mubr.msk.f32.mxu1 %vm770_vm0, %v769_v0  ;;  %v40_v6 = vld [vmem:[#allocation2 + $0x210] sm:$0xff]  ;;  %v137_v7 = vld [vmem:[#allocation2 + $0x2a8] sm:$0xff]  ;;  %v136_v8 = vld [vmem:[#allocation2 + $0x278] sm:$0xff] }
  0x10   :  { %600 = vmatpush3.msra.mxu0 %v44_v1  ;;  %635 = vmatpush3.msra.mxu1 %v138_v5  ;;  %v39_v9 = vld [vmem:[#allocation2 + $0x1e0] sm:$0xff]  ;;  %v135_v10 = vld [vmem:[#allocation2 + $0x248] sm:$0xff]  ;;  %v38_v11 = vld [vmem:[#allocation2 + $0x1b0] sm:$0xff] }
  0x11   :  { %601 = vmatprep.subr.mxu0 %v769_v0  ;;  %636 = vmatprep.subr.mxu1 %v769_v0  ;;  %v134_v12 = vld [vmem:[#allocation2 + $0x218] sm:$0xff]  ;;  %v37_v13 = vld [vmem:[#allocation2 + $0x180] sm:$0xff]  ;;  %v133_v14 = vld [vmem:[#allocation2 + $0x1e8] sm:$0xff] }
  0x12   :  { %602 = vmatpush3.msra.mxu0 %v43_v2  ;;  %637 = vmatpush3.msra.mxu1 %v137_v7  ;;  %v36_v15 = vld [vmem:[#allocation2 + $0x150] sm:$0xff]  ;;  %v132_v16 = vld [vmem:[#allocation2 + $0x1b8] sm:$0xff]  ;;  %v35_v17 = vld [vmem:[#allocation2 + $0x120] sm:$0xff] }
  0x13   :  { %603 = vmatprep.subr.mxu0 %v769_v0  ;;  %638 = vmatprep.subr.mxu1 %v769_v0  ;;  %v131_v18 = vld [vmem:[#allocation2 + $0x188] sm:$0xff]  ;;  %v34_v19 = vld [vmem:[#allocation2 + $0xf0] sm:$0xff]  ;;  %v130_v20 = vld [vmem:[#allocation2 + $0x158] sm:$0xff] }
  0x14   :  { %604 = vmatpush3.msra.mxu0 %v42_v3  ;;  %639 = vmatpush3.msra.mxu1 %v136_v8  ;;  %v33_v21 = vld [vmem:[#allocation2 + $0xc0] sm:$0xff]  ;;  %v129_v22 = vld [vmem:[#allocation2 + $0x128] sm:$0xff]  ;;  %v32_v23 = vld [vmem:[#allocation2 + $0x90] sm:$0xff] }
  0x15   :  { %605 = vmatprep.subr.mxu0 %v769_v0  ;;  %640 = vmatprep.subr.mxu1 %v769_v0  ;;  %v128_v24 = vld [vmem:[#allocation2 + $0xf8] sm:$0xff]  ;;  %v31_v25 = vld [vmem:[#allocation2 + $0x60] sm:$0xff]  ;;  %v127_v26 = vld [vmem:[#allocation2 + $0xc8] sm:$0xff] }
  0x16   :  { %606 = vmatpush3.msra.mxu0 %v41_v4  ;;  %641 = vmatpush3.msra.mxu1 %v135_v10  ;;  %v30_v27 = vld [vmem:[#allocation2 + $0x30] sm:$0xff]  ;;  %v126_v28 = vld [vmem:[#allocation2 + $0x98] sm:$0xff]  ;;  %v29_v29 = vld [vmem:[#allocation2] sm:$0xff] }
  0x17   :  { %607 = vmatprep.subr.mxu0 %v769_v0  ;;  %642 = vmatprep.subr.mxu1 %v769_v0  ;;  %v28_v30 = vld [vmem:[%s891_s0] sm:$0xff]  ;;  %v125_v31 = vld [vmem:[#allocation2 + $0x68] sm:$0xff]  ;;  %v124_v32 = vld [vmem:[#allocation2 + $0x38] sm:$0xff] }
  0x18   :  { %608 = vmatpush3.msra.mxu0 %v40_v6  ;;  %643 = vmatpush3.msra.mxu1 %v134_v12  ;;  %v123_v33 = vld [vmem:[#allocation2 + $0x8] sm:$0xff]  ;;  %v232_v34 = vld [vmem:[#allocation2 + $0x2e0] sm:$0xff]  ;;  %v231_v35 = vld [vmem:[#allocation2 + $0x2b0] sm:$0xff] }
  0x19   :  { %609 = vmatprep.subr.mxu0 %v769_v0  ;;  %644 = vmatprep.subr.mxu1 %v769_v0  ;;  %v230_v36 = vld [vmem:[#allocation2 + $0x280] sm:$0xff]  ;;  %v229_v37 = vld [vmem:[#allocation2 + $0x250] sm:$0xff]  ;;  %v326_v55 = vld [vmem:[#allocation2 + $0x2e8] sm:$0xff] }
  0x1a   :  { %610 = vmatpush3.msra.mxu0 %v39_v9  ;;  %645 = vmatpush3.msra.mxu1 %v133_v14  ;;  %v228_v38 = vld [vmem:[#allocation2 + $0x220] sm:$0xff]  ;;  %v227_v39 = vld [vmem:[#allocation2 + $0x1f0] sm:$0xff]  ;;  %v325_v56 = vld [vmem:[#allocation2 + $0x2b8] sm:$0xff] }
  0x1b   :  { %611 = vmatprep.subr.mxu0 %v769_v0  ;;  %646 = vmatprep.subr.mxu1 %v769_v0  ;;  %v226_v40 = vld [vmem:[#allocation2 + $0x1c0] sm:$0xff]  ;;  %v225_v41 = vld [vmem:[#allocation2 + $0x190] sm:$0xff]  ;;  %v324_v57 = vld [vmem:[#allocation2 + $0x288] sm:$0xff] }
  0x1c   :  { %612 = vmatpush3.msra.mxu0 %v38_v11  ;;  %647 = vmatpush3.msra.mxu1 %v132_v16  ;;  %v224_v42 = vld [vmem:[#allocation2 + $0x160] sm:$0xff]  ;;  %v223_v43 = vld [vmem:[#allocation2 + $0x130] sm:$0xff]  ;;  %v323_v58 = vld [vmem:[#allocation2 + $0x258] sm:$0xff] }
  0x1d   :  { %613 = vmatprep.subr.mxu0 %v769_v0  ;;  %648 = vmatprep.subr.mxu1 %v769_v0  ;;  %v222_v44 = vld [vmem:[#allocation2 + $0x100] sm:$0xff]  ;;  %v221_v45 = vld [vmem:[#allocation2 + $0xd0] sm:$0xff]  ;;  %v322_v59 = vld [vmem:[#allocation2 + $0x228] sm:$0xff] }
  0x1e   :  { %614 = vmatpush3.msra.mxu0 %v37_v13  ;;  %649 = vmatpush3.msra.mxu1 %v131_v18  ;;  %v220_v46 = vld [vmem:[#allocation2 + $0xa0] sm:$0xff]  ;;  %v219_v52 = vld [vmem:[#allocation2 + $0x70] sm:$0xff]  ;;  %v321_v60 = vld [vmem:[#allocation2 + $0x1f8] sm:$0xff] }
  0x1f   :  { %615 = vmatprep.subr.mxu0 %v769_v0  ;;  %650 = vmatprep.subr.mxu1 %v769_v0  ;;  %v527_v47 = vld [vmem:[%s893_s2] ss:$0 sm:$0xff]  ;;  %v217_v54 = vld [vmem:[#allocation2 + $0x10] sm:$0xff]  ;;  %v320_v61 = vld [vmem:[#allocation2 + $0x1c8] sm:$0xff] }
  0x20   :  { %616 = vmatpush3.msra.mxu0 %v36_v15  ;;  %651 = vmatpush3.msra.mxu1 %v130_v20  ;;  %v218_v53 = vld [vmem:[#allocation2 + $0x40] sm:$0xff]  ;;  %v319_v62 = vld [vmem:[#allocation2 + $0x198] sm:$0xff]  ;;  %v318_v63 = vld [vmem:[#allocation2 + $0x168] sm:$0xff] }
  0x21   :  { %617 = vmatprep.subr.mxu0 %v769_v0  ;;  %652 = vmatprep.subr.mxu1 %v769_v0  ;;  %v317_v1 = vld [vmem:[#allocation2 + $0x138] sm:$0xff]  ;;  %v316_v2 = vld [vmem:[#allocation2 + $0x108] sm:$0xff]  ;;  %v528_v5 = vld [vmem:[%s893_s2 + $0x1] ss:$0 sm:$0xff] }
  0x22   :  { %618 = vmatpush3.msra.mxu0 %v35_v17  ;;  %653 = vmatpush3.msra.mxu1 %v129_v22  ;;  %v315_v3 = vld [vmem:[#allocation2 + $0xd8] sm:$0xff]  ;;  %v314_v4 = vld [vmem:[#allocation2 + $0xa8] sm:$0xff]  ;;  %v435_v14 = vld [vmem:[#allocation2 + $0x2f0] sm:$0xff] }
  0x23   :  { %619 = vmatprep.subr.mxu0 %v769_v0  ;;  %654 = vmatprep.subr.mxu1 %v769_v0  ;;  %v313_v10 = vld [vmem:[#allocation2 + $0x78] sm:$0xff]  ;;  %v312_v11 = vld [vmem:[#allocation2 + $0x48] sm:$0xff]  ;;  %v433_v16 = vld [vmem:[#allocation2 + $0x2c0] sm:$0xff] }
  0x24   :  { %620 = vmatpush3.msra.mxu0 %v34_v19  ;;  %655 = vmatpush3.msra.mxu1 %v128_v24  ;;  %v311_v12 = vld [vmem:[#allocation2 + $0x18] sm:$0xff]  ;;  %v434_v15 = vld [vmem:[#allocation2 + $0x2c8] sm:$0xff]  ;;  %v431_v18 = vld [vmem:[#allocation2 + $0x290] sm:$0xff] }
  0x25   :  { %621 = vmatprep.subr.mxu0 %v769_v0  ;;  %656 = vmatprep.subr.mxu1 %v769_v0  ;;  %v436_v13 = vld [vmem:[#allocation2 + $0x2f8] sm:$0xff]  ;;  %v430_v19 = vld [vmem:[#allocation2 + $0x268] sm:$0xff]  ;;  %v429_v20 = vld [vmem:[#allocation2 + $0x260] sm:$0xff] }
  0x26   :  { %622 = vmatpush3.msra.mxu0 %v33_v21  ;;  %657 = vmatpush3.msra.mxu1 %v127_v26  ;;  %v432_v17 = vld [vmem:[#allocation2 + $0x298] sm:$0xff]  ;;  %v427_v22 = vld [vmem:[#allocation2 + $0x230] sm:$0xff]  ;;  %v422_v26 = vld [vmem:[#allocation2 + $0x1a8] sm:$0xff] }
  0x27   :  { %623 = vmatprep.subr.mxu0 %v769_v0  ;;  %658 = vmatprep.subr.mxu1 %v769_v0  ;;  %v428_v21 = vld [vmem:[#allocation2 + $0x238] sm:$0xff] }
  0x28   :  { %624 = vmatpush3.msra.mxu0 %v32_v23  ;;  %659 = vmatpush3.msra.mxu1 %v126_v28  ;;  %v425_v23 = vld [vmem:[#allocation2 + $0x200] sm:$0xff]  ;;  %v424_v24 = vld [vmem:[#allocation2 + $0x1d8] sm:$0xff] }
  0x29   :  { %625 = vmatprep.subr.mxu0 %v769_v0  ;;  %660 = vmatprep.subr.mxu1 %v769_v0  ;;  %v420_v28 = vld [vmem:[#allocation2 + $0x178] sm:$0xff] }
  0x2a   :  { %626 = vmatpush3.msra.mxu0 %v31_v25  ;;  %661 = vmatpush3.msra.mxu1 %v125_v31  ;;  %v423_v25 = vld [vmem:[#allocation2 + $0x1d0] sm:$0xff]  ;;  %v417_v31 = vld [vmem:[#allocation2 + $0x140] sm:$0xff] }
  0x2b   :  { %627 = vmatprep.subr.mxu0 %v769_v0  ;;  %662 = vmatprep.subr.mxu1 %v769_v0 }
  0x2c   :  { %628 = vmatpush3.msra.mxu0 %v30_v27  ;;  %663 = vmatpush3.msra.mxu1 %v124_v32  ;;  %v421_v27 = vld [vmem:[#allocation2 + $0x1a0] sm:$0xff]  ;;  %v416_v32 = vld [vmem:[#allocation2 + $0x118] sm:$0xff] }
  0x2d   :  { %629 = vmatprep.subr.mxu0 %v769_v0  ;;  %664 = vmatprep.subr.mxu1 %v769_v0 }
  0x2e   :  { %630 = vmatpush3.msra.mxu0 %v29_v29  ;;  %665 = vmatpush3.msra.mxu1 %v123_v33  ;;  %v419_v29 = vld [vmem:[#allocation2 + $0x170] sm:$0xff] }
  0x2f   :  { %632 = vmatmul.mubr.f32.vlgmr.msra.gmra.mxu0 %v28_v30  ;;  %669 = vmatprep.subr.mxu0 %v769_v0  ;;  %v418_v30 = vld [vmem:[#allocation2 + $0x148] sm:$0xff]  ;;  %v415_v33 = vld [vmem:[#allocation2 + $0x110] sm:$0xff] }
  0x30   :  { %701 = vmatprep.mubr.msk.f32.mxu0 %vm770_vm0, %v769_v0  ;;  %704 = vmatprep.subr.mxu1 %v769_v0 }
  0x31   :  { %670 = vmatpush3.msra.mxu0 %v232_v34  ;;  %v414_v34 = vld [vmem:[#allocation2 + $0xe8] sm:$0xff] }
  0x32   :  { %671 = vmatprep.subr.mxu0 %v769_v0 }
  0x33   :  { %672 = vmatpush3.msra.mxu0 %v231_v35  ;;  %v413_v35 = vld [vmem:[#allocation2 + $0xe0] sm:$0xff] }
  0x34   :  { %673 = vmatprep.subr.mxu0 %v769_v0 }
  0x35   :  { %674 = vmatpush3.msra.mxu0 %v230_v36  ;;  %v412_v36 = vld [vmem:[#allocation2 + $0xb8] sm:$0xff] }
  0x36   :  { %675 = vmatprep.subr.mxu0 %v769_v0 }
  0x37   :  { %676 = vmatpush3.msra.mxu0 %v229_v37  ;;  %v411_v37 = vld [vmem:[#allocation2 + $0xb0] sm:$0xff] }
  0x38   :  { %677 = vmatprep.subr.mxu0 %v769_v0 }
  0x39   :  { %678 = vmatpush3.msra.mxu0 %v228_v38  ;;  %v410_v38 = vld [vmem:[#allocation2 + $0x88] sm:$0xff] }
  0x3a   :  { %679 = vmatprep.subr.mxu0 %v769_v0 }
  0x3b   :  { %680 = vmatpush3.msra.mxu0 %v227_v39  ;;  %v529_v39 = vld [vmem:[%s893_s2 + $0x2] ss:$0 sm:$0xff] }
  0x3c   :  { %681 = vmatprep.subr.mxu0 %v769_v0 }
  0x3d   :  { %682 = vmatpush3.msra.mxu0 %v226_v40 }
  0x3e   :  { %683 = vmatprep.subr.mxu0 %v769_v0 }
  0x3f   :  { %684 = vmatpush3.msra.mxu0 %v225_v41 }
  0x40   :  { %685 = vmatprep.subr.mxu0 %v769_v0 }
  0x41   :  { %686 = vmatpush3.msra.mxu0 %v224_v42 }
  0x42   :  { %687 = vmatprep.subr.mxu0 %v769_v0 }
  0x43   :  { %688 = vmatpush3.msra.mxu0 %v223_v43 }
  0x44   :  { %689 = vmatprep.subr.mxu0 %v769_v0 }
  0x45   :  { %690 = vmatpush3.msra.mxu0 %v222_v44  ;;  %v409_v44 = vld [vmem:[#allocation2 + $0x80] sm:$0xff] }
  0x46   :  { %691 = vmatprep.subr.mxu0 %v769_v0 }
  0x47   :  { %692 = vmatpush3.msra.mxu0 %v221_v45  ;;  %v408_v45 = vld [vmem:[#allocation2 + $0x58] sm:$0xff] }
  0x48   :  { %693 = vmatprep.subr.mxu0 %v769_v0 }
  0x49   :  { %694 = vmatpush3.msra.mxu0 %v220_v46  ;;  %v407_v46 = vld [vmem:[#allocation2 + $0x50] sm:$0xff] }
  0x4a   :  { %695 = vmatprep.subr.mxu0 %v769_v0 }
  0x4b   :  { %696 = vmatpush3.msra.mxu0 %v219_v52 }
  0x4c   :  { %697 = vmatprep.subr.mxu0 %v769_v0 }
  0x4d   :  { %698 = vmatpush3.msra.mxu0 %v218_v53 }
  0x4e   :  { %699 = vmatprep.subr.mxu0 %v769_v0 }
  0x4f   :  { %700 = vmatpush3.msra.mxu0 %v217_v54  ;;  %v439_v54 = vlaneseq }
  0x50   :  { %449 = vmatprep.subr.mxu0 %v436_v13 }
  0xef   :  { %v118_v48 = vpop.f32.mrf.mxu0 }
  0xf0   :  { %v119_v49 = vadd.f32 %v527_v47, %v118_v48  ;;  %v406_v47 = vld [vmem:[#allocation2 + $0x28] sm:$0xff]  ;;  %v405_v48 = vld [vmem:[#allocation2 + $0x20] sm:$0xff] }
  0xf1   :  { %v633_v50 = vpop.f32.mrf.mxu0 }
  0xf2   :  { %v122_v51 = vmax.f32 %v119_v49, 0.0  ;;  %v530_v49 = vld [vmem:[%s893_s2 + $0x3] ss:$0 sm:$0xff] }
  0xf4   :  { %667 = vmatmul.mubr.f32.vlgmr.msra.gmra.mxu1 %v122_v51 }
  0xf5   :  { %736 = vmatprep.mubr.msk.f32.mxu1 %vm770_vm0, %v769_v0  ;;  %705 = vmatpush3.msra.mxu1 %v326_v55  ;;  %v440_v55 = vshrl.u32 %v439_v54, 7 }
  0xf6   :  { %706 = vmatprep.subr.mxu1 %v769_v0 }
  0xf7   :  { %707 = vmatpush3.msra.mxu1 %v325_v56  ;;  %v441_v56 = vsub.s32 0, %v440_v55 }
  0xf8   :  { %708 = vmatprep.subr.mxu1 %v769_v0 }
  0xf9   :  { %709 = vmatpush3.msra.mxu1 %v324_v57  ;;  %v437_v57 = vld [vmem:[%s893_s2 + $0x4] sm:$0x3] }
  0xfa   :  { %710 = vmatprep.subr.mxu1 %v769_v0 }
  0xfb   :  { %711 = vmatpush3.msra.mxu1 %v323_v58  ;;  %v445_v58 = vsub.s32 1, %v440_v55 }
  0xfc   :  { %712 = vmatprep.subr.mxu1 %v769_v0 }
  0xfd   :  { %713 = vmatpush3.msra.mxu1 %v322_v59  ;;  %v442_v59 = vrot.slane %v437_v57, %v441_v56 }
  0xfe   :  { %714 = vmatprep.subr.mxu1 %v769_v0 }
  0xff   :  { %715 = vmatpush3.msra.mxu1 %v321_v60  ;;  %v446_v60 = vrot.slane %v437_v57, %v445_v58 }
 0x100   :  { %716 = vmatprep.subr.mxu1 %v769_v0 }
 0x101   :  { %717 = vmatpush3.msra.mxu1 %v320_v61 }
 0x102   :  { %718 = vmatprep.subr.mxu1 %v769_v0 }
 0x103   :  { %719 = vmatpush3.msra.mxu1 %v319_v62 }
 0x104   :  { %720 = vmatprep.subr.mxu1 %v769_v0 }
 0x105   :  { %721 = vmatpush3.msra.mxu1 %v318_v63 }
 0x106   :  { %722 = vmatprep.subr.mxu1 %v769_v0 }
 0x107   :  { %723 = vmatpush3.msra.mxu1 %v317_v1 }
 0x108   :  { %724 = vmatprep.subr.mxu1 %v769_v0 }
 0x109   :  { %725 = vmatpush3.msra.mxu1 %v316_v2 }
 0x10a   :  { %726 = vmatprep.subr.mxu1 %v769_v0 }
 0x10b   :  { %727 = vmatpush3.msra.mxu1 %v315_v3 }
 0x10c   :  { %728 = vmatprep.subr.mxu1 %v769_v0 }
 0x10d   :  { %729 = vmatpush3.msra.mxu1 %v314_v4 }
 0x10e   :  { %730 = vmatprep.subr.mxu1 %v769_v0 }
 0x10f   :  { %731 = vmatpush3.msra.mxu1 %v313_v10 }
 0x110   :  { %732 = vmatprep.subr.mxu1 %v769_v0 }
 0x111   :  { %733 = vmatpush3.msra.mxu1 %v312_v11 }
 0x112   :  { %734 = vmatprep.subr.mxu1 %v769_v0 }
 0x113   :  { %735 = vmatpush3.msra.mxu1 %v311_v12 }
 0x1b4   :  { %v212_v6 = vpop.f32.mrf.mxu1 }
 0x1b5   :  { %v213_v7 = vadd.f32 %v528_v5, %v212_v6 }
 0x1b6   :  { %v668_v8 = vpop.f32.mrf.mxu1 }
 0x1b7   :  { %v216_v9 = vmax.f32 %v213_v7, 0.0 }
 0x1b9   :  { %702 = vmatmul.mubr.f32.vlgmr.msra.gmra.mxu0 %v216_v9 }
 0x1ba   :  { %513 = vmatprep.mubr.f32.mxu0 %v769_v0  ;;  %450 = vmatpush1.msra.mxu0 %v435_v14  ;;  %v426_v0 = vld [vmem:[#allocation2 + $0x208] sm:$0xff] }
 0x1bb   :  { %451 = vmatprep.subr.mxu0 %v434_v15 }
 0x1bc   :  { %452 = vmatpush1.msra.mxu0 %v433_v16 }
 0x1bd   :  { %453 = vmatprep.subr.mxu0 %v432_v17 }
 0x1be   :  { %454 = vmatpush1.msra.mxu0 %v431_v18 }
 0x1bf   :  { %455 = vmatprep.subr.mxu0 %v430_v19 }
 0x1c0   :  { %456 = vmatpush1.msra.mxu0 %v429_v20 }
 0x1c1   :  { %457 = vmatprep.subr.mxu0 %v428_v21 }
 0x1c2   :  { %458 = vmatpush1.msra.mxu0 %v427_v22 }
 0x1c3   :  { %459 = vmatprep.subr.mxu0 %v426_v0 }
 0x1c4   :  { %460 = vmatpush1.msra.mxu0 %v425_v23 }
 0x1c5   :  { %461 = vmatprep.subr.mxu0 %v424_v24 }
 0x1c6   :  { %462 = vmatpush1.msra.mxu0 %v423_v25 }
 0x1c7   :  { %463 = vmatprep.subr.mxu0 %v422_v26 }
 0x1c8   :  { %464 = vmatpush1.msra.mxu0 %v421_v27 }
 0x1c9   :  { %465 = vmatprep.subr.mxu0 %v420_v28 }
 0x1ca   :  { %466 = vmatpush1.msra.mxu0 %v419_v29 }
 0x1cb   :  { %467 = vmatprep.subr.mxu0 %v418_v30 }
 0x1cc   :  { %468 = vmatpush1.msra.mxu0 %v417_v31 }
 0x1cd   :  { %469 = vmatprep.subr.mxu0 %v416_v32 }
 0x1ce   :  { %470 = vmatpush1.msra.mxu0 %v415_v33 }
 0x1cf   :  { %471 = vmatprep.subr.mxu0 %v414_v34 }
 0x1d0   :  { %472 = vmatpush1.msra.mxu0 %v413_v35 }
 0x1d1   :  { %473 = vmatprep.subr.mxu0 %v412_v36 }
 0x1d2   :  { %474 = vmatpush1.msra.mxu0 %v411_v37 }
 0x1d3   :  { %475 = vmatprep.subr.mxu0 %v410_v38 }
 0x1d4   :  { %476 = vmatpush1.msra.mxu0 %v409_v44 }
 0x1d5   :  { %477 = vmatprep.subr.mxu0 %v408_v45 }
 0x1d6   :  { %478 = vmatpush1.msra.mxu0 %v407_v46 }
 0x1d7   :  { %479 = vmatprep.subr.mxu0 %v406_v47 }
 0x1d8   :  { %480 = vmatpush1.msra.mxu0 %v405_v48 }
 0x279   :  { %v306_v40 = vpop.f32.mrf.mxu0 }
 0x27a   :  { %v307_v41 = vadd.f32 %v529_v39, %v306_v40 }
 0x27b   :  { %v703_v42 = vpop.f32.mrf.mxu0 }
 0x27c   :  { %v310_v43 = vmax.f32 %v307_v41, 0.0 }
 0x27e   :  { %737 = vmatmul.mubr.f32.vlgmr.msra.gmra.mxu1 %v310_v43 }
 0x33e   :  { %v400_v50 = vpop.f32.mrf.mxu1 }
 0x33f   :  { %v401_v51 = vadd.f32 %v530_v49, %v400_v50 }
 0x340   :  { %v738_v52 = vpop.f32.mrf.mxu1 }
 0x341   :  { %v404_v53 = vmax.f32 %v401_v51, 0.0 }
 0x343   :  { %514 = vmatmul.mubr.f32.vlgmr.msra.gmra.mxu0 %v404_v53 }
 0x403   :  { %v515_v61 = vpop.f32.mrf.mxu0 }
 0x404   :  { %v516_v62 = vadd.f32 %v515_v61, %v442_v59 }
 0x405   :  { %v517_v63 = vpop.f32.mrf.mxu0 }
 0x406   :  { %520 = vst [vmem:[%s894_s3] sm:$0xff] %v516_v62  ;;  %v518_v1 = vadd.f32 %v517_v63, %v446_v60 }
 0x408   :  { %521 = vst [vmem:[%s894_s3 + $0x8] sm:$0xff] %v518_v1 }
 0x409   :  { %526 = vsyncpa [#allocation3], 1 }

</bundles_post_ra>
